<compile_context>
chip_gen: v6e
topology: v6e:2x2x1
jax: 0.10.0
libtpu: 0.0.40
codegen_flags: <defaults>
</compile_context>

<pallas_src>
import functools

import jax
import jax.numpy as jnp
from jax.experimental import pallas as pl
from jax.experimental.pallas import tpu as pltpu


# ----------------------------------------------------------------------------
# Pallas kernel bodies
# ----------------------------------------------------------------------------
def _agg_compute(self_ref, nbr_ref, rel_ref, ut_ref, w_ref, b_ref,
                 sel_ref, exp_ref, red_ref, act):
    """Per-batch-row KGCN sum-aggregator (all hops of one iteration fused).

    self_ref : (1, M, D)    self entity vectors (rows of all fused hops)
    nbr_ref  : (1, M, N*D)  neighbor entity vectors, lane-dense
    rel_ref  : (1, M, N*D)  neighbor relation vectors, lane-dense
    ut_ref   : (1, 1, N*D)  this row's user embedding tiled N times along lanes
    w_ref    : (D, D)       linear weight (applied as x @ W, W = W_torch.T)
    b_ref    : (1, D)       linear bias
    sel_ref  : (N*D, N)     0/1: segmented sum over D  -> attention scores
    exp_ref  : (N, N*D)     0/1: expand (M, N) probs   -> (M, N*D)
    red_ref  : (N*D, D)     0/1: sum over N neighbors  -> aggregated vector
    returns  : (M, D) activated output
    """
    nbr = nbr_ref[0]                                   # (M, N*D)
    rel = rel_ref[0]                                   # (M, N*D)
    u_t = ut_ref[0]                                    # (1, N*D)

    # user-relation attention scores; segmented lane reduce done on the MXU.
    scores = jnp.dot(u_t * rel, sel_ref[...],
                     preferred_element_type=jnp.float32)          # (M, N)
    scores = scores - jnp.max(scores, axis=-1, keepdims=True)
    p = jnp.exp(scores)
    p = p * pl.reciprocal(jnp.sum(p, axis=-1, keepdims=True), approx=True)

    # expand probabilities back to lane-dense layout, mix neighbors (MXU).
    p_full = jnp.dot(p, exp_ref[...],
                     preferred_element_type=jnp.float32)          # (M, N*D)
    agg = jnp.dot(p_full * nbr, red_ref[...],
                  preferred_element_type=jnp.float32)             # (M, D)

    # 'sum' aggregator: residual add, dense projection, activation.
    x = self_ref[0] + agg
    y = jnp.dot(x, w_ref[...], preferred_element_type=jnp.float32) + b_ref[...]
    if act == "tanh":
        return jnp.tanh(y)
    return jax.nn.sigmoid(y)


def _agg_kernel(self_ref, nbr_ref, rel_ref, ut_ref, w_ref, b_ref,
                sel_ref, exp_ref, red_ref, o_ref, *, act):
    o_ref[0] = _agg_compute(self_ref, nbr_ref, rel_ref, ut_ref, w_ref, b_ref,
                            sel_ref, exp_ref, red_ref, act)


def _agg_score_kernel(self_ref, nbr_ref, rel_ref, ut_ref, w_ref, b_ref,
                      sel_ref, exp_ref, red_ref, usr_ref, o_ref, s_ref, *, act):
    out = _agg_compute(self_ref, nbr_ref, rel_ref, ut_ref, w_ref, b_ref,
                       sel_ref, exp_ref, red_ref, act)
    o_ref[0] = out
    # Fused scoring epilogue (last iteration has a single hop, M == 1):
    # sigmoid(<user, item>) written directly, no extra kernel / HBM round trip.
    u = usr_ref[0]                                                # (1, D)
    s_ref[0] = jax.nn.sigmoid(jnp.sum(u * out, axis=-1, keepdims=True))


# ----------------------------------------------------------------------------
# pallas_call wrapper: one fused call per KGCN iteration
# ----------------------------------------------------------------------------
def aggregate_iteration(self_cat, nbr_cat, rel_cat, user_t3, user3,
                        W, b2, sel, expm, red, *, act, with_score):
    """self_cat: (B, M, D); nbr/rel_cat: (B, M, N*D) lane-dense."""
    B, M, D = self_cat.shape
    ND = nbr_cat.shape[-1]
    N = ND // D

    in_specs = [
        pl.BlockSpec((1, M, D), lambda i: (i, 0, 0)),    # self rows of batch i
        pl.BlockSpec((1, M, ND), lambda i: (i, 0, 0)),   # neighbors (lane-dense)
        pl.BlockSpec((1, M, ND), lambda i: (i, 0, 0)),   # relations (lane-dense)
        pl.BlockSpec((1, 1, ND), lambda i: (i, 0, 0)),   # tiled user (no HBM bcast)
        pl.BlockSpec((D, D), lambda i: (0, 0)),          # W       (resident)
        pl.BlockSpec((1, D), lambda i: (0, 0)),          # b       (resident)
        pl.BlockSpec((ND, N), lambda i: (0, 0)),         # SEL     (resident)
        pl.BlockSpec((N, ND), lambda i: (0, 0)),         # EXP     (resident)
        pl.BlockSpec((ND, D), lambda i: (0, 0)),         # RED     (resident)
    ]
    args = [self_cat, nbr_cat, rel_cat, user_t3, W, b2, sel, expm, red]

    # Raise the v5e 16 MiB scoped default; stays within v7x's 64 MiB physical.
    compiler_params = pltpu.CompilerParams(
        dimension_semantics=("parallel",),
        vmem_limit_bytes=32 * 1024 * 1024,
    )

    if with_score:
        in_specs.append(pl.BlockSpec((1, 1, D), lambda i: (i, 0, 0)))  # raw user
        args.append(user3)
        out_shape = (
            jax.ShapeDtypeStruct((B, M, D), jnp.float32),
            jax.ShapeDtypeStruct((B, 1, 1), jnp.float32),
        )
        out_specs = (
            pl.BlockSpec((1, M, D), lambda i: (i, 0, 0)),
            pl.BlockSpec((1, 1, 1), lambda i: (i, 0, 0)),
        )
        kernel = functools.partial(_agg_score_kernel, act=act)
    else:
        out_shape = jax.ShapeDtypeStruct((B, M, D), jnp.float32)
        out_specs = pl.BlockSpec((1, M, D), lambda i: (i, 0, 0))
        kernel = functools.partial(_agg_kernel, act=act)

    return pl.pallas_call(
        kernel,
        out_shape=out_shape,
        grid=(B,),
        in_specs=in_specs,
        out_specs=out_specs,
        compiler_params=compiler_params,
    )(*args)


# ----------------------------------------------------------------------------
# KGCN forward (index/gather glue in plain JAX; hot path in Pallas)
# ----------------------------------------------------------------------------
def kgcn_forward(u, v, params, adj_ent, adj_rel, *, n_iter, n_neighbor, dim):
    B = u.shape[0]
    D, N = dim, n_neighbor
    ND = N * D

    user_emb = params["usr"][u]                            # (B, D)
    user3 = user_emb[:, None, :]                           # (B, 1, D)
    user_t3 = jnp.tile(user_emb, (1, N))[:, None, :]       # (B, 1, N*D), tiny

    # _get_neighbors (embedding-index expansion; data-dependent gathers -> XLA)
    entities = [v[:, None]]                                # (B, 1)
    relations = []
    for h in range(n_iter):
        ne = adj_ent[entities[h]].reshape(B, -1)           # (B, N^(h+1))
        nr = adj_rel[entities[h]].reshape(B, -1)
        entities.append(ne)
        relations.append(nr)

    entity_vectors = [params["ent"][e] for e in entities]       # (B, N^h, D)
    relation_vectors = [params["rel"][r] for r in relations]    # (B, N^(h+1), D)

    W = params["W"]
    b2 = params["b"].reshape(1, D)
    # 0/1 projection constants so segmented reductions run on the idle MXU.
    sel = jnp.repeat(jnp.eye(N, dtype=jnp.float32), D, axis=0)  # (N*D, N)
    expm = sel.T                                                # (N, N*D)
    red = jnp.tile(jnp.eye(D, dtype=jnp.float32), (N, 1))       # (N*D, D)

    scores = None
    for i in range(n_iter):
        act = "tanh" if i == n_iter - 1 else "sigmoid"
        hops = n_iter - i
        Ms = [n_neighbor ** h for h in range(hops)]

        # Fuse every hop of this iteration into ONE pallas_call (shared W/b/
        # user/act) by stacking rows along the entity axis.
        selfs = [entity_vectors[h] for h in range(hops)]
        nbrs = [entity_vectors[h + 1].reshape(B, Ms[h], ND) for h in range(hops)]
        rels = [relation_vectors[h].reshape(B, Ms[h], ND) for h in range(hops)]
        self_cat = selfs[0] if hops == 1 else jnp.concatenate(selfs, axis=1)
        nbr_cat = nbrs[0] if hops == 1 else jnp.concatenate(nbrs, axis=1)
        rel_cat = rels[0] if hops == 1 else jnp.concatenate(rels, axis=1)

        if i == n_iter - 1:
            _, score3 = aggregate_iteration(
                self_cat, nbr_cat, rel_cat, user_t3, user3,
                W, b2, sel, expm, red, act=act, with_score=True)
            scores = score3.reshape(B)
        else:
            out = aggregate_iteration(
                self_cat, nbr_cat, rel_cat, user_t3, user3,
                W, b2, sel, expm, red, act=act, with_score=False)
            nxt, off = [], 0
            for m in Ms:
                nxt.append(out[:, off:off + m, :])
                off += m
            entity_vectors = nxt

    return scores


# ----------------------------------------------------------------------------
# Pure-JAX reference (for tolerance check against the Pallas path)
# ----------------------------------------------------------------------------
def kgcn_reference(u, v, params, adj_ent, adj_rel, *, n_iter, n_neighbor, dim):
    B = u.shape[0]
    user_emb = params["usr"][u]
    entities = [v[:, None]]
    relations = []
    for h in range(n_iter):
        ne = adj_ent[entities[h]].reshape(B, -1)
        nr = adj_rel[entities[h]].reshape(B, -1)
        entities.append(ne)
        relations.append(nr)
    ev = [params["ent"][e] for e in entities]
    rv = [params["rel"][r] for r in relations]
    for i in range(n_iter):
        act = jnp.tanh if i == n_iter - 1 else jax.nn.sigmoid
        nxt = []
        for hop in range(n_iter - i):
            sv = ev[hop]
            nb = ev[hop + 1].reshape(B, -1, n_neighbor, dim)
            rl = rv[hop].reshape(B, -1, n_neighbor, dim)
            sc = jnp.sum(user_emb[:, None, None, :] * rl, axis=-1)
            p = jax.nn.softmax(sc, axis=-1)
            agg = jnp.sum(p[..., None] * nb, axis=2)
            y = (sv + agg) @ params["W"] + params["b"]
            nxt.append(act(y))
        ev = nxt
    item = ev[0].reshape(B, dim)
    return jax.nn.sigmoid(jnp.sum(user_emb * item, axis=-1))


# ----------------------------------------------------------------------------
# Demo
# ----------------------------------------------------------------------------
if __name__ == "__main__":
    # Hyperparameters (small, consistent with the module's args)
    num_user, num_ent, num_rel = 16, 20, 6
    dim, n_neighbor, n_iter, batch = 32, 8, 2, 2

    key = jax.random.PRNGKey(0)
    k_usr, k_ent, k_rel, k_w, k_b, k_ae, k_ar, k_u, k_v = jax.random.split(key, 9)

    params = {
        "usr": jax.random.normal(k_usr, (num_user, dim), jnp.float32) * 0.1,
        "ent": jax.random.normal(k_ent, (num_ent, dim), jnp.float32) * 0.1,
        "rel": jax.random.normal(k_rel, (num_rel, dim), jnp.float32) * 0.1,
        # Aggregator linear layer (dim -> dim), stored as x @ W + b
        "W": jax.random.normal(k_w, (dim, dim), jnp.float32) * 0.1,
        "b": jax.random.normal(k_b, (dim,), jnp.float32) * 0.1,
    }

    # Deterministic synthetic adjacency tables (stand-in for _gen_adj sampling)
    adj_ent = jax.random.randint(k_ae, (num_ent, n_neighbor), 0, num_ent, jnp.int32)
    adj_rel = jax.random.randint(k_ar, (num_ent, n_neighbor), 0, num_rel, jnp.int32)

    # Batch of user / item indices
    u = jax.random.randint(k_u, (batch,), 0, num_user, jnp.int32)
    v = jax.random.randint(k_v, (batch,), 0, num_ent, jnp.int32)

    fwd = jax.jit(functools.partial(kgcn_forward, n_iter=n_iter,
                                    n_neighbor=n_neighbor, dim=dim))
    out = jax.block_until_ready(fwd(u, v, params, adj_ent, adj_rel))

    ref = jax.block_until_ready(
        kgcn_reference(u, v, params, adj_ent, adj_rel,
                       n_iter=n_iter, n_neighbor=n_neighbor, dim=dim))

    assert out.shape == (batch,)
    assert bool(jnp.all(jnp.isfinite(out)))
    assert bool(jnp.allclose(out, ref, rtol=2e-3, atol=2e-3)), (out, ref)
    print("KERNEL_OK")
</pallas_src>

<mosaic_0001>
module attributes {stable_mosaic.version = 11 : i64} {
  func.func @_agg_kernel(%arg0: i32, %arg1: memref<1x9x32xf32, #tpu.memory_space<vmem>>, %arg2: memref<1x9x256xf32, #tpu.memory_space<vmem>>, %arg3: memref<1x9x256xf32, #tpu.memory_space<vmem>>, %arg4: memref<1x1x256xf32, #tpu.memory_space<vmem>>, %arg5: memref<32x32xf32, #tpu.memory_space<vmem>>, %arg6: memref<1x32xf32, #tpu.memory_space<vmem>>, %arg7: memref<256x8xf32, #tpu.memory_space<vmem>>, %arg8: memref<8x256xf32, #tpu.memory_space<vmem>>, %arg9: memref<256x32xf32, #tpu.memory_space<vmem>>, %arg10: memref<1x9x32xf32, #tpu.memory_space<vmem>>) attributes {dimension_semantics = [#tpu.dimension_semantics<parallel>], iteration_bounds = array<i64: 2>, scalar_prefetch = 0 : i64, scratch_operands = 0 : i64, tpu.core_type = #tpu.core_type<tc>, window_params = [{transform_indices = @transform_0, window_bounds = array<i64: 1, 9, 32>}, {transform_indices = @transform_1, window_bounds = array<i64: 1, 9, 256>}, {transform_indices = @transform_2, window_bounds = array<i64: 1, 9, 256>}, {transform_indices = @transform_3, window_bounds = array<i64: 1, 1, 256>}, {pipeline_mode = #tpu.pipeline_mode<synchronous>, transform_indices = @transform_4, window_bounds = array<i64: 32, 32>}, {pipeline_mode = #tpu.pipeline_mode<synchronous>, transform_indices = @transform_5, window_bounds = array<i64: 1, 32>}, {pipeline_mode = #tpu.pipeline_mode<synchronous>, transform_indices = @transform_6, window_bounds = array<i64: 256, 8>}, {pipeline_mode = #tpu.pipeline_mode<synchronous>, transform_indices = @transform_7, window_bounds = array<i64: 8, 256>}, {pipeline_mode = #tpu.pipeline_mode<synchronous>, transform_indices = @transform_8, window_bounds = array<i64: 256, 32>}, {transform_indices = @transform_9, window_bounds = array<i64: 1, 9, 32>}]} {
    %c0 = arith.constant 0 : index
    %c0_0 = arith.constant 0 : index
    %c0_1 = arith.constant 0 : index
    %0 = vector.load %arg2[%c0, %c0_0, %c0_1] : memref<1x9x256xf32, #tpu.memory_space<vmem>>, vector<1x9x256xf32>
    %1 = vector.shape_cast %0 : vector<1x9x256xf32> to vector<9x256xf32>
    %c0_2 = arith.constant 0 : index
    %c0_3 = arith.constant 0 : index
    %c0_4 = arith.constant 0 : index
    %2 = vector.load %arg3[%c0_2, %c0_3, %c0_4] : memref<1x9x256xf32, #tpu.memory_space<vmem>>, vector<1x9x256xf32>
    %3 = vector.shape_cast %2 : vector<1x9x256xf32> to vector<9x256xf32>
    %c0_5 = arith.constant 0 : index
    %c0_6 = arith.constant 0 : index
    %c0_7 = arith.constant 0 : index
    %4 = vector.load %arg4[%c0_5, %c0_6, %c0_7] : memref<1x1x256xf32, #tpu.memory_space<vmem>>, vector<1x1x256xf32>
    %5 = vector.shape_cast %4 : vector<1x1x256xf32> to vector<1x256xf32>
    %6 = vector.broadcast %5 : vector<1x256xf32> to vector<9x256xf32>
    %7 = arith.mulf %6, %3 : vector<9x256xf32>
    %c0_8 = arith.constant 0 : index
    %c0_9 = arith.constant 0 : index
    %8 = vector.load %arg7[%c0_8, %c0_9] : memref<256x8xf32, #tpu.memory_space<vmem>>, vector<256x8xf32>
    %cst = arith.constant dense<0.000000e+00> : vector<9x8xf32>
    %9 = tpu.matmul %7, %8, %cst {dimension_numbers = #tpu.dot_dimension_numbers<[1], [0], [0], [1], [0, 0, 1, 1], [], []>} : vector<9x256xf32>, vector<256x8xf32>, vector<9x8xf32> -> vector<9x8xf32>
    %cst_10 = arith.constant dense<0xFF800000> : vector<9xf32>
    %10 = vector.multi_reduction <maximumf>, %9, %cst_10 [1] : vector<9x8xf32> to vector<9xf32>
    %11 = vector.shape_cast %10 : vector<9xf32> to vector<9x1xf32>
    %12 = vector.broadcast %11 : vector<9x1xf32> to vector<9x8xf32>
    %13 = arith.subf %9, %12 : vector<9x8xf32>
    %14 = math.exp %13 : vector<9x8xf32>
    %cst_11 = arith.constant dense<0.000000e+00> : vector<9xf32>
    %15 = vector.multi_reduction <add>, %14, %cst_11 [1] : vector<9x8xf32> to vector<9xf32>
    %16 = vector.shape_cast %15 : vector<9xf32> to vector<9x1xf32>
    %17 = tpu.reciprocal %16 {approx = true} : vector<9x1xf32> -> vector<9x1xf32>
    %18 = vector.broadcast %17 : vector<9x1xf32> to vector<9x8xf32>
    %19 = arith.mulf %14, %18 : vector<9x8xf32>
    %c0_12 = arith.constant 0 : index
    %c0_13 = arith.constant 0 : index
    %20 = vector.load %arg8[%c0_12, %c0_13] : memref<8x256xf32, #tpu.memory_space<vmem>>, vector<8x256xf32>
    %cst_14 = arith.constant dense<0.000000e+00> : vector<9x256xf32>
    %21 = tpu.matmul %19, %20, %cst_14 {dimension_numbers = #tpu.dot_dimension_numbers<[1], [0], [0], [1], [0, 0, 1, 1], [], []>} : vector<9x8xf32>, vector<8x256xf32>, vector<9x256xf32> -> vector<9x256xf32>
    %22 = arith.mulf %21, %1 : vector<9x256xf32>
    %c0_15 = arith.constant 0 : index
    %c0_16 = arith.constant 0 : index
    %23 = vector.load %arg9[%c0_15, %c0_16] : memref<256x32xf32, #tpu.memory_space<vmem>>, vector<256x32xf32>
    %cst_17 = arith.constant dense<0.000000e+00> : vector<9x32xf32>
    %24 = tpu.matmul %22, %23, %cst_17 {dimension_numbers = #tpu.dot_dimension_numbers<[1], [0], [0], [1], [0, 0, 1, 1], [], []>} : vector<9x256xf32>, vector<256x32xf32>, vector<9x32xf32> -> vector<9x32xf32>
    %c0_18 = arith.constant 0 : index
    %c0_19 = arith.constant 0 : index
    %c0_20 = arith.constant 0 : index
    %25 = vector.load %arg1[%c0_18, %c0_19, %c0_20] : memref<1x9x32xf32, #tpu.memory_space<vmem>>, vector<1x9x32xf32>
    %26 = vector.shape_cast %25 : vector<1x9x32xf32> to vector<9x32xf32>
    %27 = arith.addf %26, %24 : vector<9x32xf32>
    %c0_21 = arith.constant 0 : index
    %c0_22 = arith.constant 0 : index
    %28 = vector.load %arg5[%c0_21, %c0_22] : memref<32x32xf32, #tpu.memory_space<vmem>>, vector<32x32xf32>
    %cst_23 = arith.constant dense<0.000000e+00> : vector<9x32xf32>
    %29 = tpu.matmul %27, %28, %cst_23 {dimension_numbers = #tpu.dot_dimension_numbers<[1], [0], [0], [1], [0, 0, 1, 1], [], []>} : vector<9x32xf32>, vector<32x32xf32>, vector<9x32xf32> -> vector<9x32xf32>
    %c0_24 = arith.constant 0 : index
    %c0_25 = arith.constant 0 : index
    %30 = vector.load %arg6[%c0_24, %c0_25] : memref<1x32xf32, #tpu.memory_space<vmem>>, vector<1x32xf32>
    %31 = vector.broadcast %30 : vector<1x32xf32> to vector<9x32xf32>
    %32 = arith.addf %29, %31 : vector<9x32xf32>
    %33 = arith.negf %32 : vector<9x32xf32>
    %34 = math.exp %33 : vector<9x32xf32>
    %cst_26 = arith.constant 1.000000e+00 : f32
    %35 = vector.broadcast %cst_26 : f32 to vector<9x32xf32>
    %36 = arith.addf %35, %34 : vector<9x32xf32>
    %37 = arith.divf %35, %36 : vector<9x32xf32>
    %c0_27 = arith.constant 0 : index
    %c0_28 = arith.constant 0 : index
    %c0_29 = arith.constant 0 : index
    %38 = vector.load %arg10[%c0_27, %c0_28, %c0_29] : memref<1x9x32xf32, #tpu.memory_space<vmem>>, vector<1x9x32xf32>
    %39 = vector.shape_cast %38 : vector<1x9x32xf32> to vector<9x32xf32>
    %40 = vector.shape_cast %37 : vector<9x32xf32> to vector<1x9x32xf32>
    tpu.vector_store %arg10[%c0_27, %c0_28, %c0_29], %40 {strides = array<i32>} : memref<1x9x32xf32, #tpu.memory_space<vmem>>, vector<1x9x32xf32>,
    return
  }
  func.func @transform_0(%arg0: i32) -> (i32, i32, i32) {
    %c0_i32 = arith.constant 0 : i32
    %c0_i32_0 = arith.constant 0 : i32
    %c0_i32_1 = arith.constant 0 : i32
    return %arg0, %c0_i32, %c0_i32_0 : i32, i32, i32
  }
  func.func @transform_1(%arg0: i32) -> (i32, i32, i32) {
    %c0_i32 = arith.constant 0 : i32
    %c0_i32_0 = arith.constant 0 : i32
    %c0_i32_1 = arith.constant 0 : i32
    return %arg0, %c0_i32, %c0_i32_0 : i32, i32, i32
  }
  func.func @transform_2(%arg0: i32) -> (i32, i32, i32) {
    %c0_i32 = arith.constant 0 : i32
    %c0_i32_0 = arith.constant 0 : i32
    %c0_i32_1 = arith.constant 0 : i32
    return %arg0, %c0_i32, %c0_i32_0 : i32, i32, i32
  }
  func.func @transform_3(%arg0: i32) -> (i32, i32, i32) {
    %c0_i32 = arith.constant 0 : i32
    %c0_i32_0 = arith.constant 0 : i32
    %c0_i32_1 = arith.constant 0 : i32
    return %arg0, %c0_i32, %c0_i32_0 : i32, i32, i32
  }
  func.func @transform_4(%arg0: i32) -> (i32, i32) {
    %c0_i32 = arith.constant 0 : i32
    %c0_i32_0 = arith.constant 0 : i32
    %c0_i32_1 = arith.constant 0 : i32
    return %c0_i32, %c0_i32_0 : i32, i32
  }
  func.func @transform_5(%arg0: i32) -> (i32, i32) {
    %c0_i32 = arith.constant 0 : i32
    %c0_i32_0 = arith.constant 0 : i32
    %c0_i32_1 = arith.constant 0 : i32
    return %c0_i32, %c0_i32_0 : i32, i32
  }
  func.func @transform_6(%arg0: i32) -> (i32, i32) {
    %c0_i32 = arith.constant 0 : i32
    %c0_i32_0 = arith.constant 0 : i32
    %c0_i32_1 = arith.constant 0 : i32
    return %c0_i32, %c0_i32_0 : i32, i32
  }
  func.func @transform_7(%arg0: i32) -> (i32, i32) {
    %c0_i32 = arith.constant 0 : i32
    %c0_i32_0 = arith.constant 0 : i32
    %c0_i32_1 = arith.constant 0 : i32
    return %c0_i32, %c0_i32_0 : i32, i32
  }
  func.func @transform_8(%arg0: i32) -> (i32, i32) {
    %c0_i32 = arith.constant 0 : i32
    %c0_i32_0 = arith.constant 0 : i32
    %c0_i32_1 = arith.constant 0 : i32
    return %c0_i32, %c0_i32_0 : i32, i32
  }
  func.func @transform_9(%arg0: i32) -> (i32, i32, i32) {
    %c0_i32 = arith.constant 0 : i32
    %c0_i32_0 = arith.constant 0 : i32
    %c0_i32_1 = arith.constant 0 : i32
    return %arg0, %c0_i32, %c0_i32_0 : i32, i32, i32
  }
}

module attributes {stable_mosaic.version = 11 : i64} {
  func.func @_agg_score_kernel(%arg0: i32, %arg1: memref<1x1x32xf32, #tpu.memory_space<vmem>>, %arg2: memref<1x1x256xf32, #tpu.memory_space<vmem>>, %arg3: memref<1x1x256xf32, #tpu.memory_space<vmem>>, %arg4: memref<1x1x256xf32, #tpu.memory_space<vmem>>, %arg5: memref<32x32xf32, #tpu.memory_space<vmem>>, %arg6: memref<1x32xf32, #tpu.memory_space<vmem>>, %arg7: memref<256x8xf32, #tpu.memory_space<vmem>>, %arg8: memref<8x256xf32, #tpu.memory_space<vmem>>, %arg9: memref<256x32xf32, #tpu.memory_space<vmem>>, %arg10: memref<1x1x32xf32, #tpu.memory_space<vmem>>, %arg11: memref<1x1x32xf32, #tpu.memory_space<vmem>>, %arg12: memref<1x1x1xf32, #tpu.memory_space<vmem>>) attributes {dimension_semantics = [#tpu.dimension_semantics<parallel>], iteration_bounds = array<i64: 2>, scalar_prefetch = 0 : i64, scratch_operands = 0 : i64, tpu.core_type = #tpu.core_type<tc>, window_params = [{transform_indices = @transform_0, window_bounds = array<i64: 1, 1, 32>}, {transform_indices = @transform_1, window_bounds = array<i64: 1, 1, 256>}, {transform_indices = @transform_2, window_bounds = array<i64: 1, 1, 256>}, {transform_indices = @transform_3, window_bounds = array<i64: 1, 1, 256>}, {pipeline_mode = #tpu.pipeline_mode<synchronous>, transform_indices = @transform_4, window_bounds = array<i64: 32, 32>}, {pipeline_mode = #tpu.pipeline_mode<synchronous>, transform_indices = @transform_5, window_bounds = array<i64: 1, 32>}, {pipeline_mode = #tpu.pipeline_mode<synchronous>, transform_indices = @transform_6, window_bounds = array<i64: 256, 8>}, {pipeline_mode = #tpu.pipeline_mode<synchronous>, transform_indices = @transform_7, window_bounds = array<i64: 8, 256>}, {pipeline_mode = #tpu.pipeline_mode<synchronous>, transform_indices = @transform_8, window_bounds = array<i64: 256, 32>}, {transform_indices = @transform_9, window_bounds = array<i64: 1, 1, 32>}, {transform_indices = @transform_10, window_bounds = array<i64: 1, 1, 32>}, {transform_indices = @transform_11, window_bounds = array<i64: 1, 1, 1>}]} {
    %c0 = arith.constant 0 : index
    %c0_0 = arith.constant 0 : index
    %c0_1 = arith.constant 0 : index
    %0 = vector.load %arg2[%c0, %c0_0, %c0_1] : memref<1x1x256xf32, #tpu.memory_space<vmem>>, vector<1x1x256xf32>
    %1 = vector.shape_cast %0 : vector<1x1x256xf32> to vector<1x256xf32>
    %c0_2 = arith.constant 0 : index
    %c0_3 = arith.constant 0 : index
    %c0_4 = arith.constant 0 : index
    %2 = vector.load %arg3[%c0_2, %c0_3, %c0_4] : memref<1x1x256xf32, #tpu.memory_space<vmem>>, vector<1x1x256xf32>
    %3 = vector.shape_cast %2 : vector<1x1x256xf32> to vector<1x256xf32>
    %c0_5 = arith.constant 0 : index
    %c0_6 = arith.constant 0 : index
    %c0_7 = arith.constant 0 : index
    %4 = vector.load %arg4[%c0_5, %c0_6, %c0_7] : memref<1x1x256xf32, #tpu.memory_space<vmem>>, vector<1x1x256xf32>
    %5 = vector.shape_cast %4 : vector<1x1x256xf32> to vector<1x256xf32>
    %6 = arith.mulf %5, %3 : vector<1x256xf32>
    %c0_8 = arith.constant 0 : index
    %c0_9 = arith.constant 0 : index
    %7 = vector.load %arg7[%c0_8, %c0_9] : memref<256x8xf32, #tpu.memory_space<vmem>>, vector<256x8xf32>
    %cst = arith.constant dense<0.000000e+00> : vector<1x8xf32>
    %8 = tpu.matmul %6, %7, %cst {dimension_numbers = #tpu.dot_dimension_numbers<[1], [0], [0], [1], [0, 0, 1, 1], [], []>} : vector<1x256xf32>, vector<256x8xf32>, vector<1x8xf32> -> vector<1x8xf32>
    %cst_10 = arith.constant dense<0xFF800000> : vector<1xf32>
    %9 = vector.multi_reduction <maximumf>, %8, %cst_10 [1] : vector<1x8xf32> to vector<1xf32>
    %10 = vector.shape_cast %9 : vector<1xf32> to vector<1x1xf32>
    %11 = vector.broadcast %10 : vector<1x1xf32> to vector<1x8xf32>
    %12 = arith.subf %8, %11 : vector<1x8xf32>
    %13 = math.exp %12 : vector<1x8xf32>
    %cst_11 = arith.constant dense<0.000000e+00> : vector<1xf32>
    %14 = vector.multi_reduction <add>, %13, %cst_11 [1] : vector<1x8xf32> to vector<1xf32>
    %15 = vector.shape_cast %14 : vector<1xf32> to vector<1x1xf32>
    %16 = tpu.reciprocal %15 {approx = true} : vector<1x1xf32> -> vector<1x1xf32>
    %17 = vector.broadcast %16 : vector<1x1xf32> to vector<1x8xf32>
    %18 = arith.mulf %13, %17 : vector<1x8xf32>
    %c0_12 = arith.constant 0 : index
    %c0_13 = arith.constant 0 : index
    %19 = vector.load %arg8[%c0_12, %c0_13] : memref<8x256xf32, #tpu.memory_space<vmem>>, vector<8x256xf32>
    %cst_14 = arith.constant dense<0.000000e+00> : vector<1x256xf32>
    %20 = tpu.matmul %18, %19, %cst_14 {dimension_numbers = #tpu.dot_dimension_numbers<[1], [0], [0], [1], [0, 0, 1, 1], [], []>} : vector<1x8xf32>, vector<8x256xf32>, vector<1x256xf32> -> vector<1x256xf32>
    %21 = arith.mulf %20, %1 : vector<1x256xf32>
    %c0_15 = arith.constant 0 : index
    %c0_16 = arith.constant 0 : index
    %22 = vector.load %arg9[%c0_15, %c0_16] : memref<256x32xf32, #tpu.memory_space<vmem>>, vector<256x32xf32>
    %cst_17 = arith.constant dense<0.000000e+00> : vector<1x32xf32>
    %23 = tpu.matmul %21, %22, %cst_17 {dimension_numbers = #tpu.dot_dimension_numbers<[1], [0], [0], [1], [0, 0, 1, 1], [], []>} : vector<1x256xf32>, vector<256x32xf32>, vector<1x32xf32> -> vector<1x32xf32>
    %c0_18 = arith.constant 0 : index
    %c0_19 = arith.constant 0 : index
    %c0_20 = arith.constant 0 : index
    %24 = vector.load %arg1[%c0_18, %c0_19, %c0_20] : memref<1x1x32xf32, #tpu.memory_space<vmem>>, vector<1x1x32xf32>
    %25 = vector.shape_cast %24 : vector<1x1x32xf32> to vector<1x32xf32>
    %26 = arith.addf %25, %23 : vector<1x32xf32>
    %c0_21 = arith.constant 0 : index
    %c0_22 = arith.constant 0 : index
    %27 = vector.load %arg5[%c0_21, %c0_22] : memref<32x32xf32, #tpu.memory_space<vmem>>, vector<32x32xf32>
    %cst_23 = arith.constant dense<0.000000e+00> : vector<1x32xf32>
    %28 = tpu.matmul %26, %27, %cst_23 {dimension_numbers = #tpu.dot_dimension_numbers<[1], [0], [0], [1], [0, 0, 1, 1], [], []>} : vector<1x32xf32>, vector<32x32xf32>, vector<1x32xf32> -> vector<1x32xf32>
    %c0_24 = arith.constant 0 : index
    %c0_25 = arith.constant 0 : index
    %29 = vector.load %arg6[%c0_24, %c0_25] : memref<1x32xf32, #tpu.memory_space<vmem>>, vector<1x32xf32>
    %30 = arith.addf %28, %29 : vector<1x32xf32>
    %31 = math.tanh %30 : vector<1x32xf32>
    %c0_26 = arith.constant 0 : index
    %c0_27 = arith.constant 0 : index
    %c0_28 = arith.constant 0 : index
    %32 = vector.load %arg11[%c0_26, %c0_27, %c0_28] : memref<1x1x32xf32, #tpu.memory_space<vmem>>, vector<1x1x32xf32>
    %33 = vector.shape_cast %32 : vector<1x1x32xf32> to vector<1x32xf32>
    %34 = vector.shape_cast %31 : vector<1x32xf32> to vector<1x1x32xf32>
    tpu.vector_store %arg11[%c0_26, %c0_27, %c0_28], %34 {strides = array<i32>} : memref<1x1x32xf32, #tpu.memory_space<vmem>>, vector<1x1x32xf32>,
    %c0_29 = arith.constant 0 : index
    %c0_30 = arith.constant 0 : index
    %c0_31 = arith.constant 0 : index
    %35 = vector.load %arg10[%c0_29, %c0_30, %c0_31] : memref<1x1x32xf32, #tpu.memory_space<vmem>>, vector<1x1x32xf32>
    %36 = vector.shape_cast %35 : vector<1x1x32xf32> to vector<1x32xf32>
    %37 = arith.mulf %36, %31 : vector<1x32xf32>
    %cst_32 = arith.constant dense<0.000000e+00> : vector<1xf32>
    %38 = vector.multi_reduction <add>, %37, %cst_32 [1] : vector<1x32xf32> to vector<1xf32>
    %39 = vector.shape_cast %38 : vector<1xf32> to vector<1x1xf32>
    %40 = arith.negf %39 : vector<1x1xf32>
    %41 = math.exp %40 : vector<1x1xf32>
    %cst_33 = arith.constant 1.000000e+00 : f32
    %42 = vector.broadcast %cst_33 : f32 to vector<1x1xf32>
    %43 = arith.addf %42, %41 : vector<1x1xf32>
    %44 = arith.divf %42, %43 : vector<1x1xf32>
    %c0_34 = arith.constant 0 : index
    %c0_35 = arith.constant 0 : index
    %c0_36 = arith.constant 0 : index
    %45 = vector.load %arg12[%c0_34, %c0_35, %c0_36] : memref<1x1x1xf32, #tpu.memory_space<vmem>>, vector<1x1x1xf32>
    %46 = vector.shape_cast %45 : vector<1x1x1xf32> to vector<1x1xf32>
    %47 = vector.shape_cast %44 : vector<1x1xf32> to vector<1x1x1xf32>
    tpu.vector_store %arg12[%c0_34, %c0_35, %c0_36], %47 {strides = array<i32>} : memref<1x1x1xf32, #tpu.memory_space<vmem>>, vector<1x1x1xf32>,
    return
  }
  func.func @transform_0(%arg0: i32) -> (i32, i32, i32) {
    %c0_i32 = arith.constant 0 : i32
    %c0_i32_0 = arith.constant 0 : i32
    %c0_i32_1 = arith.constant 0 : i32
    return %arg0, %c0_i32, %c0_i32_0 : i32, i32, i32
  }
  func.func @transform_1(%arg0: i32) -> (i32, i32, i32) {
    %c0_i32 = arith.constant 0 : i32
    %c0_i32_0 = arith.constant 0 : i32
    %c0_i32_1 = arith.constant 0 : i32
    return %arg0, %c0_i32, %c0_i32_0 : i32, i32, i32
  }
  func.func @transform_2(%arg0: i32) -> (i32, i32, i32) {
    %c0_i32 = arith.constant 0 : i32
    %c0_i32_0 = arith.constant 0 : i32
    %c0_i32_1 = arith.constant 0 : i32
    return %arg0, %c0_i32, %c0_i32_0 : i32, i32, i32
  }
  func.func @transform_3(%arg0: i32) -> (i32, i32, i32) {
    %c0_i32 = arith.constant 0 : i32
    %c0_i32_0 = arith.constant 0 : i32
    %c0_i32_1 = arith.constant 0 : i32
    return %arg0, %c0_i32, %c0_i32_0 : i32, i32, i32
  }
  func.func @transform_4(%arg0: i32) -> (i32, i32) {
    %c0_i32 = arith.constant 0 : i32
    %c0_i32_0 = arith.constant 0 : i32
    %c0_i32_1 = arith.constant 0 : i32
    return %c0_i32, %c0_i32_0 : i32, i32
  }
  func.func @transform_5(%arg0: i32) -> (i32, i32) {
    %c0_i32 = arith.constant 0 : i32
    %c0_i32_0 = arith.constant 0 : i32
    %c0_i32_1 = arith.constant 0 : i32
    return %c0_i32, %c0_i32_0 : i32, i32
  }
  func.func @transform_6(%arg0: i32) -> (i32, i32) {
    %c0_i32 = arith.constant 0 : i32
    %c0_i32_0 = arith.constant 0 : i32
    %c0_i32_1 = arith.constant 0 : i32
    return %c0_i32, %c0_i32_0 : i32, i32
  }
  func.func @transform_7(%arg0: i32) -> (i32, i32) {
    %c0_i32 = arith.constant 0 : i32
    %c0_i32_0 = arith.constant 0 : i32
    %c0_i32_1 = arith.constant 0 : i32
    return %c0_i32, %c0_i32_0 : i32, i32
  }
  func.func @transform_8(%arg0: i32) -> (i32, i32) {
    %c0_i32 = arith.constant 0 : i32
    %c0_i32_0 = arith.constant 0 : i32
    %c0_i32_1 = arith.constant 0 : i32
    return %c0_i32, %c0_i32_0 : i32, i32
  }
  func.func @transform_9(%arg0: i32) -> (i32, i32, i32) {
    %c0_i32 = arith.constant 0 : i32
    %c0_i32_0 = arith.constant 0 : i32
    %c0_i32_1 = arith.constant 0 : i32
    return %arg0, %c0_i32, %c0_i32_0 : i32, i32, i32
  }
  func.func @transform_10(%arg0: i32) -> (i32, i32, i32) {
    %c0_i32 = arith.constant 0 : i32
    %c0_i32_0 = arith.constant 0 : i32
    %c0_i32_1 = arith.constant 0 : i32
    return %arg0, %c0_i32, %c0_i32_0 : i32, i32, i32
  }
  func.func @transform_11(%arg0: i32) -> (i32, i32, i32) {
    %c0_i32 = arith.constant 0 : i32
    %c0_i32_0 = arith.constant 0 : i32
    %c0_i32_1 = arith.constant 0 : i32
    return %arg0, %c0_i32, %c0_i32_0 : i32, i32, i32
  }
}

</mosaic_0001>

<bundles_post_ra>
// kernel: kgcn_forward.3
= control target key start
LH: loop header
LB: loop body
LE: loop exit
PB: predicated region body
PF: predicated region fallthrough
CT: control target
= control target key end

     0   :  { %17 = vsyncpa [#allocation3], 0  ;;  %s1624_s0 = inlined_call_operand.vmem [shape: f32[2,1,32], index: 0, kind: input, shape index: {}]   ;;  %s1625_s1 = inlined_call_operand.vmem [shape: f32[2,1,256], index: 1, kind: input, shape index: {}]   ;;  %s1626_s2 = inlined_call_operand.vmem [shape: f32[2,1,256], index: 2, kind: input, shape index: {}]   ;;  %s1627_s3 = inlined_call_operand.vmem [shape: f32[2,1,256], index: 3, kind: input, shape index: {}]   ;;  %s1628_s4 = inlined_call_operand.vmem [shape: f32[32,32], index: 4, kind: input, shape index: {}]   ;;  %s1629_s5 = inlined_call_operand.vmem [shape: f32[1,32], index: 5, kind: input, shape index: {}]   ;;  %s1630_s6 = inlined_call_operand.vmem [shape: f32[256,8], index: 6, kind: input, shape index: {}]   ;;  %s1631_s7 = inlined_call_operand.vmem [shape: f32[8,256], index: 7, kind: input, shape index: {}]   ;;  %s1632_s8 = inlined_call_operand.vmem [shape: f32[256,32], index: 8, kind: input, shape index: {}]   ;;  %s1633_s9 = inlined_call_operand.vmem [shape: f32[2,1,32], index: 9, kind: input, shape index: {}]   ;;  %s1634_s10 = inlined_call_operand.hbm [shape: f32[2,1,32], index: 10, kind: output, shape index: {0}]   ;;  %s1635_s11 = inlined_call_operand.vmem [shape: f32[2,1,1], index: 11, kind: output, shape index: {1}]  }
   0x1   :  { %19 = vsyncpa [#allocation3 + $0x1], 0  ;;  %s1280_s17 = smov 0   ;;  %s1282_s18 = smov 0  }
   0x2   :  { %s1284_s19 = smov 0   ;;  %s1286_s20 = smov 0  }
   0x3 LB: > { %1640 = sst [smem:[#allocation5_spill]] %s1211_s19  ;;  %s1301_s21 = sadd.s32 4294967295, %s1215_s20   ;;  %s1215_s20 = sphi %s1286_s20, %s1647_s20   ;;  %s1211_s19 = sphi %s1284_s19, %s1649_s19   ;;  %s1207_s18 = sphi %s1282_s18, %s1651_s18   ;;  %s1203_s17 = sphi %s1280_s17, %s1650_s17  }
   0x4   : > { %s1005_s22 = sadd.s32 4294967294, %s1215_s20   ;;  %s1305_s23 = sadd.s32 1, %s1215_s20  }
   0x5   : > { %1641 = sst [smem:[#allocation6_spill]] %s1305_s23  ;;  %s267_s24 = sadd.s32 1, %s1211_s19 }
   0x6   : > { %s264_s25 = ssub.s32 %s1215_s20, %s1305_s23  ;;  %p277_p0 = scmp.ne.s32.totalorder %s1211_s19, %s1207_s18 }
   0x7   : > { %p265_p1 = scmp.eq.s32.totalorder %s264_s25, 0  ;;  %p278_p2 = scmp.eq.s32.totalorder %s1301_s21, 1 }
   0x8   : > { %p283_p3 = scmp.ne.s32.totalorder %s1207_s18, %s1203_s17  ;;  %p284_p4 = scmp.eq.s32.totalorder %s1005_s22, 1 }
   0x9   : > { %s1316_s26 = scalar_select %p265_p1, %s1211_s19, %s267_s24  }
   0xa   : > { %p1318_p5 = por %p278_p2, %p277_p0  ;;  %p1322_p6 = por %p284_p4, %p283_p3 }
   0xb   : > { %1642 = sst [smem:[#allocation7_spill]] %s1316_s26  ;;  %p1008_p7 = scmp.ge.s32.totalorder %s1215_s20, 1 }
   0xc   : > { %s1644_s28 = scalar_select %p1322_p6, 1, 0 }
   0xd   : > { %p376_p8 = scmp.lt.s32.totalorder %s1215_s20, 3 }
   0xe   : > { %1645 = sst [smem:[#allocation8_spill]] %s1644_s28 }
   0xf   : > { %p377_p9 = pnand %p1008_p7, %p376_p8 }
  0x10   : > { %p431_p10 = scmp.lt.s32.totalorder (!%p377_p9), %s1301_s21, 1  ;;  %s424_s14 = sand.u32 (!%p377_p9), 1, %s1207_s18  }
  0x11   : > { %380 = sbr.rel (%p377_p9) target bundleno = 1344 (0x540), region = 60  ;;  %s425_s28 = scalar_lea.vmem (!%p377_p9), [#allocation2], %s424_s14 }
  0x12   : > { %s1015_s16 = sshll.u32 (!%p377_p9), %s1301_s21, 4 }
  0x13   : > { %s884_s25 = scalar_lea.hbm (!%p377_p9), %s1634_s10, %s1015_s16 }
  0x16   : > { %v487_v0 = vld [vmem:[%s1630_s6 + $0xf8] sm:$0xff]  ;;  %v486_v2 = vld [vmem:[%s1630_s6 + $0xf0] sm:$0xff]  ;;  %v485_v4 = vld [vmem:[%s1630_s6 + $0xe8] sm:$0xff]  ;;  %s1345_s29 = scalar_select %p431_p10, %s1301_s21, 1  ;;  %v489_v5 = vlaneseq  ;;  %vm569_vm0 = vcmask 57344   ;;  %v1217_v52 = vmov 0.0  }
  0x17   : > { %v471_v1 = vld [vmem:[%s1630_s6 + $0x78] sm:$0xff]  ;;  %1018 = vmatprep.subr.mxu0 %v487_v0  ;;  %v470_v3 = vld [vmem:[%s1630_s6 + $0x70] sm:$0xff]  ;;  %v469_v6 = vld [vmem:[%s1630_s6 + $0x68] sm:$0xff]  ;;  %651 = vmatprep.mubr.f32.mxu1 %v1217_v52  ;;  %vm583_vm1 = vcmask 64512   ;;  %vm1218_vm2 = vmmov 0   ;;  %vm780_vm3 = vcmask 261120  }
  0x18   : > { %1019 = vmatpush3.msra.mxu0 %v471_v1  ;;  %v484_v7 = vld [vmem:[%s1630_s6 + $0xe0] sm:$0xff]  ;;  %s1354_s15 = sshll.u32 %s1345_s29, 1  ;;  %v483_v9 = vld [vmem:[%s1630_s6 + $0xd8] sm:$0xff]  ;;  %v1362_v10 = vshrl.u32 %v489_v5, 7  ;;  %v482_v12 = vld [vmem:[%s1630_s6 + $0xd0] sm:$0xff]  ;;  %s433_s30 = scalar_lea.vmem %s1624_s0, %s1345_s29  ;;  %vm855_vm4 = vcmask 253952  }
  0x19   : > { %1020 = vmatprep.subr.mxu0 %v486_v2  ;;  %v468_v8 = vld [vmem:[%s1630_s6 + $0x60] sm:$0xff]  ;;  %v467_v11 = vld [vmem:[%s1630_s6 + $0x58] sm:$0xff]  ;;  %s441_s26 = scalar_lea.vmem %s1626_s2, %s1354_s15  ;;  %s445_s24 = scalar_lea.vmem %s1627_s3, %s1354_s15  ;;  %v466_v13 = vld [vmem:[%s1630_s6 + $0x50] sm:$0xff] }
  0x1a   : > { %1021 = vmatpush3.msra.mxu0 %v470_v3  ;;  %v481_v14 = vld [vmem:[%s1630_s6 + $0xc8] sm:$0xff]  ;;  %v453_v15 = vld [vmem:[%s441_s26] sm:$0x3]  ;;  %v495_v16 = vsub.s32 1, %v1362_v10  ;;  %v479_v22 = vld [vmem:[%s1630_s6 + $0xb8] sm:$0xff]  ;;  %v491_v35 = vsub.s32 0, %v1362_v10  ;;  %s437_s19 = scalar_lea.vmem %s1625_s1, %s1354_s15  ;;  %s448_s15 = scalar_lea.vmem %s1633_s9, %s1345_s29 }
  0x1b   : > { %1022 = vmatprep.subr.mxu0 %v485_v4  ;;  %v465_v17 = vld [vmem:[%s1630_s6 + $0x48] sm:$0xff]  ;;  %v454_v18 = vld [vmem:[%s445_s24] sm:$0x3]  ;;  %v463_v24 = vld [vmem:[%s1630_s6 + $0x38] sm:$0xff]  ;;  %s886_s26 = sshll.u32 %s425_s28, 4  ;;  %s887_s26 = int_to_ptr.vmem [resolvable:$true] %s886_s26 }
  0x1c   : > { %1023 = vmatpush3.msra.mxu0 %v469_v6  ;;  %v480_v19 = vld [vmem:[%s1630_s6 + $0xc0] sm:$0xff]  ;;  %v455_v20 = vmul.f32 %v454_v18, %v453_v15  ;;  %v478_v25 = vld [vmem:[%s1630_s6 + $0xb0] sm:$0xff]  ;;  %v477_v27 = vld [vmem:[%s1630_s6 + $0xa8] sm:$0xff]  ;;  %s1155_s12 = scalar_lea.vmem %s887_s26, 16 }
  0x1d   : > { %1024 = vmatprep.subr.mxu0 %v484_v7  ;;  %v464_v21 = vld [vmem:[%s1630_s6 + $0x40] sm:$0xff]  ;;  %v462_v26 = vld [vmem:[%s1630_s6 + $0x30] sm:$0xff]  ;;  %v461_v28 = vld [vmem:[%s1630_s6 + $0x28] sm:$0xff]  ;;  %p1156_p11 = scmp.ne.s32.totalorder %s887_s26, %s1155_s12 }
  0x1e   : > { %1025 = vmatpush3.msra.mxu0 %v468_v8  ;;  %v496_v23 = vrot.slane %v455_v20, %v495_v16  ;;  %v476_v29 = vld [vmem:[%s1630_s6 + $0xa0] sm:$0xff]  ;;  %v475_v31 = vld [vmem:[%s1630_s6 + $0x98] sm:$0xff]  ;;  %v474_v33 = vld [vmem:[%s1630_s6 + $0x90] sm:$0xff]  ;;  %v492_v40 = vrot.slane %v455_v20, %v491_v35 }
  0x1f   : > { %1026 = vmatprep.subr.mxu0 %v483_v9  ;;  %v460_v30 = vld [vmem:[%s1630_s6 + $0x20] sm:$0xff]  ;;  %v459_v32 = vld [vmem:[%s1630_s6 + $0x18] sm:$0xff]  ;;  %v458_v34 = vld [vmem:[%s1630_s6 + $0x10] sm:$0xff]  ;;  %p1157_p12 = pnand %p1156_p11, %p1318_p5 }
  0x20   : > { %1027 = vmatpush3.msra.mxu0 %v467_v11  ;;  %563 = vmatprep.mubr.f32.mxu0 %v496_v23  ;;  %v473_v36 = vld [vmem:[%s1630_s6 + $0x88] sm:$0xff]  ;;  %v472_v38 = vld [vmem:[%s1630_s6 + $0x80] sm:$0xff]  ;;  %v702_v53 = vld [vmem:[%s1632_s8 + $0xf8] sm:$0xff] }
  0x21   : > { %1028 = vmatprep.subr.mxu0 %v482_v12  ;;  %v457_v37 = vld [vmem:[%s1630_s6 + $0x8] sm:$0xff]  ;;  %v456_v39 = vld [vmem:[%s1630_s6] sm:$0xff]  ;;  %v686_v57 = vld [vmem:[%s1632_s8 + $0x78] sm:$0xff]  ;;  %p1158_p13 = pneg %p1157_p12 }
  0x22   : > { %1029 = vmatpush3.msra.mxu0 %v466_v13  ;;  %v582_v50 = vld [vmem:[%s1631_s7 + $0x8] sm:$0xff]  ;;  %v581_v51 = vld [vmem:[%s1631_s7] sm:$0xff]  ;;  %v701_v58 = vld [vmem:[%s1632_s8 + $0xf0] sm:$0xff] }
  0x23   : > { %1030 = vmatprep.subr.mxu0 %v481_v14  ;;  %617 = vmatprep.subr.mxu1 %v582_v50  ;;  %v685_v59 = vld [vmem:[%s1632_s8 + $0x70] sm:$0xff]  ;;  %v700_v60 = vld [vmem:[%s1632_s8 + $0xe8] sm:$0xff]  ;;  %v699_v62 = vld [vmem:[%s1632_s8 + $0xe0] sm:$0xff] }
  0x24   : > { %1031 = vmatpush3.msra.mxu0 %v465_v17  ;;  %618 = vmatpush1.msra.mxu1 %v581_v51  ;;  %v684_v61 = vld [vmem:[%s1632_s8 + $0x68] sm:$0xff]  ;;  %v683_v63 = vld [vmem:[%s1632_s8 + $0x60] sm:$0xff]  ;;  %v698_v0 = vld [vmem:[%s1632_s8 + $0xd8] sm:$0xff] }
  0x25   : > { %1032 = vmatprep.subr.mxu0 %v480_v19  ;;  %1053 = vmatprep.subr.mxu1 %v702_v53  ;;  %v682_v1 = vld [vmem:[%s1632_s8 + $0x58] sm:$0xff]  ;;  %v697_v2 = vld [vmem:[%s1632_s8 + $0xd0] sm:$0xff]  ;;  %v696_v4 = vld [vmem:[%s1632_s8 + $0xc8] sm:$0xff] }
  0x26   : > { %1033 = vmatpush3.msra.mxu0 %v464_v21  ;;  %v681_v3 = vld [vmem:[%s1632_s8 + $0x50] sm:$0xff]  ;;  %v680_v5 = vld [vmem:[%s1632_s8 + $0x48] sm:$0xff]  ;;  %v695_v6 = vld [vmem:[%s1632_s8 + $0xc0] sm:$0xff] }
  0x27   : > { %1034 = vmatprep.subr.mxu0 %v479_v22  ;;  %v679_v7 = vld [vmem:[%s1632_s8 + $0x40] sm:$0xff]  ;;  %v694_v8 = vld [vmem:[%s1632_s8 + $0xb8] sm:$0xff]  ;;  %v693_v11 = vld [vmem:[%s1632_s8 + $0xb0] sm:$0xff] }
  0x28   : > { %1035 = vmatpush3.msra.mxu0 %v463_v24  ;;  %v678_v9 = vld [vmem:[%s1632_s8 + $0x38] sm:$0xff]  ;;  %v677_v12 = vld [vmem:[%s1632_s8 + $0x30] sm:$0xff]  ;;  %v692_v13 = vld [vmem:[%s1632_s8 + $0xa8] sm:$0xff] }
  0x29   : > { %1036 = vmatprep.subr.mxu0 %v478_v25  ;;  %v676_v14 = vld [vmem:[%s1632_s8 + $0x28] sm:$0xff]  ;;  %v691_v15 = vld [vmem:[%s1632_s8 + $0xa0] sm:$0xff]  ;;  %v690_v18 = vld [vmem:[%s1632_s8 + $0x98] sm:$0xff] }
  0x2a   : > { %1037 = vmatpush3.msra.mxu0 %v462_v26  ;;  %v675_v17 = vld [vmem:[%s1632_s8 + $0x20] sm:$0xff]  ;;  %v674_v19 = vld [vmem:[%s1632_s8 + $0x18] sm:$0xff]  ;;  %v689_v20 = vld [vmem:[%s1632_s8 + $0x90] sm:$0xff] }
  0x2b   : > { %1038 = vmatprep.subr.mxu0 %v477_v27  ;;  %v673_v21 = vld [vmem:[%s1632_s8 + $0x10] sm:$0xff]  ;;  %v688_v22 = vld [vmem:[%s1632_s8 + $0x88] sm:$0xff]  ;;  %v687_v24 = vld [vmem:[%s1632_s8 + $0x80] sm:$0xff] }
  0x2c   : > { %1039 = vmatpush3.msra.mxu0 %v461_v28  ;;  %v672_v23 = vld [vmem:[%s1632_s8 + $0x8] sm:$0xff]  ;;  %v671_v25 = vld [vmem:[%s1632_s8] sm:$0xff] }
  0x2d   : > { %1040 = vmatprep.subr.mxu0 %v476_v29  ;;  %v452_v26 = vld [vmem:[%s437_s19] sm:$0x3]  ;;  %v776_v10 = vld [vmem:[%s1628_s4 + $0x8] sm:$0xff]  ;;  %s1219_s19 = smov [#allocation2]  }
  0x2e   : > { %1041 = vmatpush3.msra.mxu0 %v460_v30  ;;  %v666_v27 = vrot.slane %v452_v26, %v495_v16  ;;  %v662_v29 = vrot.slane %v452_v26, %v491_v35  ;;  %v777_v16 = vld [vmem:[%s1628_s4 + $0x10] sm:$0xff]  ;;  %s1159_s13 = sshll.u32 %s1219_s19, 4  ;;  %s1160_s13 = int_to_ptr.vmem [resolvable:$false] %s1159_s13 }
  0x2f   : > { %1042 = vmatprep.subr.mxu0 %v475_v31  ;;  %s1161_s23 = scalar_lea.vmem %s1160_s13, 32  ;;  %p1162_p0 = scmp.lt.s32.totalorder %s887_s26, %s1160_s13 }
  0x30   : > { %1043 = vmatpush3.msra.mxu0 %v459_v32  ;;  %p1163_p1 = scmp.lt.s32.totalorder %s1161_s23, %s1155_s12 }
  0x31   : > { %1044 = vmatprep.subr.mxu0 %v474_v33  ;;  %v778_v33 = vld [vmem:[%s1628_s4 + $0x18] sm:$0xff] }
  0x32   : > { %1045 = vmatpush3.msra.mxu0 %v458_v34  ;;  %v775_v34 = vld [vmem:[%s1628_s4] sm:$0xff]  ;;  %p1164_p2 = por %p1163_p1, %p1162_p0 }
  0x33   : > { %1046 = vmatprep.subr.mxu0 %v473_v36 }
  0x34   : > { %1047 = vmatpush3.msra.mxu0 %v457_v37  ;;  %v773_v37 = vld [vmem:[%s433_s30] sm:$0x1]  ;;  %s871_s30 = scalar_lea.sflag [#allocation3], %s424_s14  ;;  %p1165_p3 = pnand %p1164_p2, %p1158_p13 }
  0x35   : > { %1048 = vmatprep.subr.mxu0 %v472_v38 }
  0x36   : > { %1049 = vmatpush3.msra.mxu0 %v456_v39 }
  0x37   : > { %564 = vmatmul.mubr.f32.vlgmr.msra.gmra.mxu0 %v492_v40  ;;  %1093 = vmatprep.subr.mxu0 %v1217_v52  ;;  %v779_v40 = vld [vmem:[%s1629_s5] sm:$0x1] }
  0x38   : > { %1094 = vmatpush3.msra.mxu0 %v778_v33  ;;  %1101 = vmatprep.mubr.msk.f32.mxu0 %vm1218_vm2, %v1217_v52 }
  0x39   : > { %1095 = vmatprep.subr.mxu0 %v1217_v52 }
  0x3a   : > { %1096 = vmatpush3.msra.mxu0 %v777_v16 }
  0x3b   : > { %1097 = vmatprep.subr.mxu0 %v1217_v52 }
  0x3c   : > { %1098 = vmatpush3.msra.mxu0 %v776_v10 }
  0x3d   : > { %1099 = vmatprep.subr.mxu0 %v1217_v52 }
  0x3e   : > { %1100 = vmatpush3.msra.mxu0 %v775_v34 }
  0xf7   : > { %v1050_v41 = vpop.f32.mrf.mxu0 }
  0xf9   : > { %v1051_v42 = vpop.f32.mrf.mxu0 }
  0xfa   : > { %v1052_v43 = vadd.f32 %v1051_v42, %v1050_v41 }
  0xfc   : > { %v570_v44 = vsel %vm569_vm0, %v1052_v43, -inf }
  0xfd   : > { %571 = vmax.xlane.f32.xlu0 %v570_v44  ;;  %v857_v44 = vld [vmem:[%s448_s15] sm:$0x1] }
 0x186   : > { %v572_v45 = vpop.xlane.xlu0 %571 }
 0x187   : > { %v573_v46 = vsub.f32 %v1052_v43, %v572_v45 }
 0x189   : > { %v574_v47 = vmul.f32 1.442695, %v573_v46 }
 0x18b   : > { %1145 = vpow2.f32 %v574_v47 }
 0x198   : > { %v1146_v48 = vpop.eup %1145 }
 0x199   : > { %v576_v49 = vsel %vm569_vm0, %v1146_v48, 0.0 }
 0x19a   : > { %577 = vadd.xlane.f32.xlu0 %v576_v49 }
 0x223   : > { %v578_v54 = vpop.xlane.xlu0 %577 }
 0x224   : > { %1147 = vrcp.f32 %v578_v54 }
 0x231   : > { %v1148_v55 = vpop.eup %1147 }
 0x232   : > { %v580_v56 = vmul.f32 %v1148_v55, %v1146_v48 }
 0x234   : > { %1012 = vmatmul.mubr.msk.f32.vlgmr.msra.gmra.mxu1 %vm583_vm1, %v580_v56 }
 0x235   : > { %1054 = vmatpush3.msra.mxu1 %v686_v57 }
 0x236   : > { %1055 = vmatprep.subr.mxu1 %v701_v58 }
 0x237   : > { %1056 = vmatpush3.msra.mxu1 %v685_v59 }
 0x238   : > { %1057 = vmatprep.subr.mxu1 %v700_v60 }
 0x239   : > { %1058 = vmatpush3.msra.mxu1 %v684_v61 }
 0x23a   : > { %1059 = vmatprep.subr.mxu1 %v699_v62 }
 0x23b   : > { %1060 = vmatpush3.msra.mxu1 %v683_v63 }
 0x23c   : > { %1061 = vmatprep.subr.mxu1 %v698_v0 }
 0x23d   : > { %1062 = vmatpush3.msra.mxu1 %v682_v1 }
 0x23e   : > { %1063 = vmatprep.subr.mxu1 %v697_v2 }
 0x23f   : > { %1064 = vmatpush3.msra.mxu1 %v681_v3 }
 0x240   : > { %1065 = vmatprep.subr.mxu1 %v696_v4 }
 0x241   : > { %1066 = vmatpush3.msra.mxu1 %v680_v5 }
 0x242   : > { %1067 = vmatprep.subr.mxu1 %v695_v6 }
 0x243   : > { %1068 = vmatpush3.msra.mxu1 %v679_v7 }
 0x244   : > { %1069 = vmatprep.subr.mxu1 %v694_v8 }
 0x245   : > { %1070 = vmatpush3.msra.mxu1 %v678_v9 }
 0x246   : > { %1071 = vmatprep.subr.mxu1 %v693_v11 }
 0x247   : > { %1072 = vmatpush3.msra.mxu1 %v677_v12 }
 0x248   : > { %1073 = vmatprep.subr.mxu1 %v692_v13 }
 0x249   : > { %1074 = vmatpush3.msra.mxu1 %v676_v14 }
 0x24a   : > { %1075 = vmatprep.subr.mxu1 %v691_v15 }
 0x24b   : > { %1076 = vmatpush3.msra.mxu1 %v675_v17 }
 0x24c   : > { %1077 = vmatprep.subr.mxu1 %v690_v18 }
 0x24d   : > { %1078 = vmatpush3.msra.mxu1 %v674_v19 }
 0x24e   : > { %1079 = vmatprep.subr.mxu1 %v689_v20 }
 0x24f   : > { %1080 = vmatpush3.msra.mxu1 %v673_v21 }
 0x250   : > { %1081 = vmatprep.subr.mxu1 %v688_v22 }
 0x251   : > { %1082 = vmatpush3.msra.mxu1 %v672_v23 }
 0x252   : > { %1083 = vmatprep.subr.mxu1 %v687_v24 }
 0x253   : > { %1084 = vmatpush3.msra.mxu1 %v671_v25 }
 0x2f4   : > { %v653_v28 = vpop.f32.mrf.mxu1 }
 0x2f5   : > { %v669_v32 = vmul.f32 %v662_v29, %v653_v28 }
 0x2f6   : > { %v655_v30 = vpop.f32.mrf.mxu1 }
 0x2f7   : > { %v670_v31 = vmul.f32 %v666_v27, %v655_v30 }
 0x2f9   : > { %767 = vmatprep.mubr.f32.mxu1 %v670_v31 }
 0x2fa   : > { %768 = vmatmul.mubr.f32.vlgmr.msra.gmra.mxu1 %v669_v32 }
 0x3ba   : > { %v1085_v35 = vpop.f32.mrf.mxu1 }
 0x3bc   : > { %v1086_v36 = vpop.f32.mrf.mxu1 }
 0x3bd   : > { %v1087_v38 = vadd.f32 %v1086_v36, %v1085_v35 }
 0x3bf   : > { %v774_v39 = vadd.f32 %v1087_v38, %v773_v37 }
 0x3c1   : > { %1102 = vmatmul.mubr.msk.f32.vlgmr.msra.gmra.mxu0 %vm780_vm3, %v774_v39 }
 0x481   : > { %v850_v41 = vpop.f32.mrf.mxu0 }
 0x482   : > { %v851_v42 = vadd.f32 %v850_v41, %v779_v40 }
 0x483   : > { %v1103_v43 = vpop.f32.mrf.mxu0 }
 0x484   : > { %1149 = vtanh.f32 %v851_v42 }
 0x491   : > { %v1150_v45 = vpop.eup %1149 }
 0x492   : > { %v858_v46 = vmul.f32 %v1150_v45, %v857_v44  ;;  %856 = vst.msk [vmem:[%s425_s28] sm:$0x1] %vm855_vm4, %v1150_v45 }
 0x494   : > { %v859_v47 = vsel %vm855_vm4, %v858_v46, 0.0 }
 0x495   : > { %860 = vadd.xlane.f32.xlu1 %v859_v47 }
 0x496   : > { %1168 = shalt.err (!%p1165_p3)
}
 0x497   : > { %s1169_s21 = scalar_lea.hbm %s884_s25, 16  ;;  %s1173_s28 = scalar_lea.hbm %s1634_s10, 32 }
 0x498   : > { %p1170_p4 = scmp.ne.s32.totalorder %s884_s25, %s1169_s21  ;;  %p1174_p9 = scmp.lt.s32.totalorder %s884_s25, %s1634_s10 }
 0x499   : > { %p1175_p10 = scmp.lt.s32.totalorder %s1173_s28, %s1169_s21 }
 0x49a   : > { %p1171_p7 = pnand %p1170_p4, %p1318_p5 }
 0x49b   : > { %p1176_p11 = por %p1175_p10, %p1174_p9 }
 0x49c   : > { %p1172_p8 = pneg %p1171_p7 }
 0x49e   : > { %p1177_p12 = pnand %p1176_p11, %p1172_p8 }
 0x4a0   : > { %1180 = shalt.err (!%p1177_p12)
}
 0x4a1   : > { %1104 = dma.vmem_to_hbm [thread:$0]  (%p1318_p5), %s887_s26, 16, %s884_s25, %s871_s30   ;;  %vm868_vm5 = vcmask 0  }
 0x4a2   : > { %s451_s19 = scalar_lea.vmem %s1635_s11, %s1345_s29 }
 0x51e   : > { %v861_v48 = vpop.xlane.xlu1 %860 }
 0x51f   : > { %v1014_v49 = vmul.f32 -1.442695, %v861_v48 }
 0x521   : > { %1151 = vpow2.f32 %v1014_v49 }
 0x52e   : > { %v1152_v50 = vpop.eup %1151 }
 0x52f   : > { %v865_v51 = vadd.f32 1.0, %v1152_v50 }
 0x531   : > { %1153 = vrcp.f32 %v865_v51 }
 0x53e   : > { %v1154_v52 = vpop.eup %1153 }
 0x53f   : > { %869 = vst.msk [vmem:[%s451_s19] sm:$0x1] %vm868_vm5, %v1154_v52 }
 0x540 PF: > { %p1110_p13 = scmp.ge.s32.totalorder %s1215_s20, 2  ;;  %s901_s27 = sand.u32 1, %s1203_s17  }
 0x541   : > { %s902_s26 = scalar_lea.sflag [#allocation3], %s901_s27 }
 0x542   : > { %p1107_p5 = pnand %p1110_p13, %p1322_p6 }
 0x544   : > { %p1108_p0 = pneg %p1107_p5 }
 0x546   : > { %1198 = dma.done.wait (%p1108_p0), %s902_s26, 16  }
 0x547   : > { %1200 = vsyncadd (%p1108_p0), %s902_s26, 4294967280  ;;  %s1647_s20 = sld [smem:[#allocation6_spill]]  ;;  %s1650_s17 = smov %s1207_s18 }
 0x548   : > { %s1648_s25 = sld [smem:[#allocation5_spill]] }
 0x549   : > { %s1649_s19 = sld [smem:[#allocation7_spill]] }
 0x54d   : > { %p22_p1 = scmp.ge.s32.totalorder %s1647_s20, 4  }
 0x54e   : > { %s1651_s18 = smov %s1648_s25 }
 0x54f   :  { %24 = sbr.rel (!%p22_p1) target bundleno = 3 (0x3), region = 119 }
 0x554   :  { %912 = vsyncpa [#allocation3], 1 }
 0x555   :  { %914 = vsyncpa [#allocation3 + $0x1], 1 }

// kernel: kgcn_forward.2
= control target key start
LH: loop header
LB: loop body
LE: loop exit
PB: predicated region body
PF: predicated region fallthrough
CT: control target
= control target key end

     0   :  { %s1148_s30 = smov 0   ;;  %s1415_s0 = inlined_call_operand.vmem [shape: f32[2,9,32], index: 0, kind: input, shape index: {}]   ;;  %s1416_s1 = inlined_call_operand.vmem [shape: f32[2,9,256], index: 1, kind: input, shape index: {}]   ;;  %s1417_s2 = inlined_call_operand.vmem [shape: f32[2,9,256], index: 2, kind: input, shape index: {}]   ;;  %s1418_s3 = inlined_call_operand.vmem [shape: f32[2,1,256], index: 3, kind: input, shape index: {}]   ;;  %s1419_s4 = inlined_call_operand.vmem [shape: f32[32,32], index: 4, kind: input, shape index: {}]   ;;  %s1420_s5 = inlined_call_operand.vmem [shape: f32[1,32], index: 5, kind: input, shape index: {}]   ;;  %s1421_s6 = inlined_call_operand.vmem [shape: f32[256,8], index: 6, kind: input, shape index: {}]   ;;  %s1422_s7 = inlined_call_operand.vmem [shape: f32[8,256], index: 7, kind: input, shape index: {}]   ;;  %s1423_s8 = inlined_call_operand.vmem [shape: f32[256,32], index: 8, kind: input, shape index: {}]   ;;  %s1424_s9 = inlined_call_operand.vmem [shape: f32[2,9,32], index: 9, kind: output, shape index: {}]  }
   0x1 LB: > { %s944_s10 = sadd.s32 4294967295, %s1095_s30   ;;  %p948_p0 = scmp.ge.s32.totalorder %s1095_s30, 1  ;;  %s1095_s30 = sphi %s1148_s30, %s19_s30  }
   0x2   : > { %p316_p1 = scmp.lt.s32.totalorder %s1095_s30, 3 }
   0x4   : > { %p317_p2 = pnand %p948_p0, %p316_p1 }
   0x5   : > { %p366_p3 = scmp.lt.s32.totalorder (!%p317_p2), %s944_s10, 1 }
   0x6   : > { %320 = sbr.rel (%p317_p2) target bundleno = 1184 (0x4a0), region = 56 }
   0xb   : > { %v445_v0 = vld [vmem:[%s1421_s6 + $0xf8] sm:$0xff]  ;;  %v444_v2 = vld [vmem:[%s1421_s6 + $0xf0] sm:$0xff]  ;;  %v400_v3 = vlaneseq  ;;  %v443_v5 = vld [vmem:[%s1421_s6 + $0xe8] sm:$0xff]  ;;  %s1426_s10 = smov (!%p366_p3, %s944_s10), 1  ;;  %vm521_vm0 = vcmask 64512   ;;  %vm525_vm1 = vcmask 57344  }
   0xc   : > { %v429_v1 = vld [vmem:[%s1421_s6 + $0x78] sm:$0xff]  ;;  %971 = vmatprep.subr.mxu0 %v445_v0  ;;  %v428_v4 = vld [vmem:[%s1421_s6 + $0x70] sm:$0xff]  ;;  %v427_v6 = vld [vmem:[%s1421_s6 + $0x68] sm:$0xff]  ;;  %s968_s27 = sshll.u32 %s1426_s10, 5  ;;  %s955_s28 = sshll.u32 %s1426_s10, 1  ;;  %vm756_vm2 = vcmask 261120  }
   0xd   : > { %972 = vmatpush3.msra.mxu0 %v429_v1  ;;  %v442_v7 = vld [vmem:[%s1421_s6 + $0xe0] sm:$0xff]  ;;  %v401_v8 = vshrl.u32 %v400_v3, 7  ;;  %v441_v10 = vld [vmem:[%s1421_s6 + $0xd8] sm:$0xff]  ;;  %v440_v12 = vld [vmem:[%s1421_s6 + $0xd0] sm:$0xff]  ;;  %s1198_s18 = scalar_lea.vmem %s1417_s2, %s968_s27  ;;  %s384_s21 = scalar_lea.vmem %s1418_s3, %s955_s28  ;;  %v1097_v3 = vmov 0.0   ;;  %vm851_vm3 = vcmask 253952  }
   0xe   : > { %973 = vmatprep.subr.mxu0 %v444_v2  ;;  %v426_v9 = vld [vmem:[%s1421_s6 + $0x60] sm:$0xff]  ;;  %v425_v11 = vld [vmem:[%s1421_s6 + $0x58] sm:$0xff]  ;;  %v424_v14 = vld [vmem:[%s1421_s6 + $0x50] sm:$0xff]  ;;  %617 = vmatprep.mubr.f32.mxu1 %v1097_v3  ;;  %s375_s28 = scalar_lea.vmem %s1416_s1, %s968_s27  ;;  %s967_s17 = sshll.u32 %s1426_s10, 4 }
   0xf   : > { %974 = vmatpush3.msra.mxu0 %v428_v4  ;;  %v406_v13 = vsub.s32 1, %v401_v8  ;;  %v439_v15 = vld [vmem:[%s1421_s6 + $0xc8] sm:$0xff]  ;;  %v398_v18 = vld [vmem:[%s384_s21] sm:$0x3]  ;;  %v437_v22 = vld [vmem:[%s1421_s6 + $0xb8] sm:$0xff]  ;;  %v402_v31 = vsub.s32 0, %v401_v8  ;;  %s370_s21 = scalar_lea.vmem %s1415_s0, %s967_s17  ;;  %s389_s26 = scalar_lea.vmem %s1424_s9, %s967_s17 }
  0x10   : > { %975 = vmatprep.subr.mxu0 %v443_v5  ;;  %v423_v16 = vld [vmem:[%s1421_s6 + $0x48] sm:$0xff]  ;;  %v438_v19 = vld [vmem:[%s1421_s6 + $0xc0] sm:$0xff]  ;;  %v421_v24 = vld [vmem:[%s1421_s6 + $0x38] sm:$0xff] }
  0x11   : > { %976 = vmatpush3.msra.mxu0 %v427_v6  ;;  %v395_v17 = vld [vmem:[%s1198_s18 + $0x8] sm:$0xff]  ;;  %v407_v20 = vrot.slane %v398_v18, %v406_v13  ;;  %v422_v21 = vld [vmem:[%s1421_s6 + $0x40] sm:$0xff]  ;;  %v436_v25 = vld [vmem:[%s1421_s6 + $0xb0] sm:$0xff]  ;;  %v403_v36 = vrot.slane %v398_v18, %v402_v31 }
  0x12   : > { %977 = vmatprep.subr.mxu0 %v442_v7  ;;  %v420_v26 = vld [vmem:[%s1421_s6 + $0x30] sm:$0xff]  ;;  %v435_v27 = vld [vmem:[%s1421_s6 + $0xa8] sm:$0xff]  ;;  %v434_v29 = vld [vmem:[%s1421_s6 + $0xa0] sm:$0xff] }
  0x13   : > { %978 = vmatpush3.msra.mxu0 %v426_v9  ;;  %v411_v23 = vmul.f32 %v407_v20, %v395_v17  ;;  %v419_v28 = vld [vmem:[%s1421_s6 + $0x28] sm:$0xff]  ;;  %v418_v30 = vld [vmem:[%s1421_s6 + $0x20] sm:$0xff]  ;;  %v433_v32 = vld [vmem:[%s1421_s6 + $0x98] sm:$0xff] }
  0x14   : > { %979 = vmatprep.subr.mxu0 %v441_v10  ;;  %v417_v33 = vld [vmem:[%s1421_s6 + $0x18] sm:$0xff]  ;;  %v432_v34 = vld [vmem:[%s1421_s6 + $0x90] sm:$0xff]  ;;  %v431_v37 = vld [vmem:[%s1421_s6 + $0x88] sm:$0xff] }
  0x15   : > { %980 = vmatpush3.msra.mxu0 %v425_v11  ;;  %510 = vmatprep.mubr.f32.mxu0 %v411_v23  ;;  %v416_v35 = vld [vmem:[%s1421_s6 + $0x10] sm:$0xff]  ;;  %v394_v38 = vld [vmem:[%s1198_s18] sm:$0xff]  ;;  %v415_v39 = vld [vmem:[%s1421_s6 + $0x8] sm:$0xff] }
  0x16   : > { %981 = vmatprep.subr.mxu0 %v440_v12  ;;  %v397_v40 = vld [vmem:[%s1198_s18 + $0x18] sm:$0x1]  ;;  %v430_v41 = vld [vmem:[%s1421_s6 + $0x80] sm:$0xff]  ;;  %v410_v43 = vmul.f32 %v403_v36, %v394_v38  ;;  %v396_v45 = vld [vmem:[%s1198_s18 + $0x10] sm:$0x1] }
  0x17   : > { %982 = vmatpush3.msra.mxu0 %v424_v14  ;;  %v414_v42 = vld [vmem:[%s1421_s6] sm:$0xff]  ;;  %v413_v44 = vmul.f32 %v407_v20, %v397_v40  ;;  %v412_v46 = vmul.f32 %v403_v36, %v396_v45  ;;  %v546_v1 = vld [vmem:[%s1422_s7 + $0x8] sm:$0xff]  ;;  %v665_v4 = vld [vmem:[%s1423_s8 + $0xf8] sm:$0xff] }
  0x18   : > { %983 = vmatprep.subr.mxu0 %v439_v15  ;;  %v545_v2 = vld [vmem:[%s1422_s7] sm:$0xff]  ;;  %583 = vmatprep.subr.mxu1 %v546_v1  ;;  %v649_v9 = vld [vmem:[%s1423_s8 + $0x78] sm:$0xff]  ;;  %v664_v10 = vld [vmem:[%s1423_s8 + $0xf0] sm:$0xff] }
  0x19   : > { %984 = vmatpush3.msra.mxu0 %v423_v16  ;;  %584 = vmatpush1.msra.mxu1 %v545_v2  ;;  %v648_v11 = vld [vmem:[%s1423_s8 + $0x70] sm:$0xff]  ;;  %v663_v13 = vld [vmem:[%s1423_s8 + $0xe8] sm:$0xff]  ;;  %v662_v16 = vld [vmem:[%s1423_s8 + $0xe0] sm:$0xff] }
  0x1a   : > { %985 = vmatprep.subr.mxu0 %v438_v19  ;;  %1009 = vmatprep.subr.mxu1 %v665_v4  ;;  %v647_v15 = vld [vmem:[%s1423_s8 + $0x68] sm:$0xff]  ;;  %v646_v17 = vld [vmem:[%s1423_s8 + $0x60] sm:$0xff]  ;;  %v661_v18 = vld [vmem:[%s1423_s8 + $0xd8] sm:$0xff] }
  0x1b   : > { %986 = vmatpush3.msra.mxu0 %v422_v21  ;;  %v645_v19 = vld [vmem:[%s1423_s8 + $0x58] sm:$0xff]  ;;  %v660_v20 = vld [vmem:[%s1423_s8 + $0xd0] sm:$0xff]  ;;  %v643_v23 = vld [vmem:[%s1423_s8 + $0x48] sm:$0xff] }
  0x1c   : > { %987 = vmatprep.subr.mxu0 %v437_v22  ;;  %v644_v21 = vld [vmem:[%s1423_s8 + $0x50] sm:$0xff]  ;;  %v659_v22 = vld [vmem:[%s1423_s8 + $0xc8] sm:$0xff]  ;;  %v650_v40 = vld [vmem:[%s1423_s8 + $0x80] sm:$0xff] }
  0x1d   : > { %988 = vmatpush3.msra.mxu0 %v421_v24  ;;  %v658_v24 = vld [vmem:[%s1423_s8 + $0xc0] sm:$0xff]  ;;  %v639_v31 = vld [vmem:[%s1423_s8 + $0x28] sm:$0xff]  ;;  %v652_v36 = vld [vmem:[%s1423_s8 + $0x90] sm:$0xff] }
  0x1e   : > { %989 = vmatprep.subr.mxu0 %v436_v25  ;;  %v642_v25 = vld [vmem:[%s1423_s8 + $0x40] sm:$0xff]  ;;  %v651_v38 = vld [vmem:[%s1423_s8 + $0x88] sm:$0xff] }
  0x1f   : > { %990 = vmatpush3.msra.mxu0 %v420_v26  ;;  %v657_v26 = vld [vmem:[%s1423_s8 + $0xb8] sm:$0xff]  ;;  %v742_v1 = vld [vmem:[%s370_s21 + $0x8] sm:$0x1]  ;;  %v960_v4 = vld [vmem:[%s1420_s5] ss:$0 sm:$0xff] }
  0x20   : > { %991 = vmatprep.subr.mxu0 %v435_v27  ;;  %v641_v27 = vld [vmem:[%s1423_s8 + $0x38] sm:$0xff] }
  0x21   : > { %992 = vmatpush3.msra.mxu0 %v419_v28  ;;  %v656_v28 = vld [vmem:[%s1423_s8 + $0xb0] sm:$0xff] }
  0x22   : > { %993 = vmatprep.subr.mxu0 %v434_v29  ;;  %v640_v29 = vld [vmem:[%s1423_s8 + $0x30] sm:$0xff] }
  0x23   : > { %994 = vmatpush3.msra.mxu0 %v418_v30  ;;  %v655_v30 = vld [vmem:[%s1423_s8 + $0xa8] sm:$0xff] }
  0x24   : > { %995 = vmatprep.subr.mxu0 %v433_v32  ;;  %v654_v32 = vld [vmem:[%s1423_s8 + $0xa0] sm:$0xff] }
  0x25   : > { %996 = vmatpush3.msra.mxu0 %v417_v33  ;;  %v638_v33 = vld [vmem:[%s1423_s8 + $0x20] sm:$0xff] }
  0x26   : > { %997 = vmatprep.subr.mxu0 %v432_v34  ;;  %v653_v34 = vld [vmem:[%s1423_s8 + $0x98] sm:$0xff] }
  0x27   : > { %998 = vmatpush3.msra.mxu0 %v416_v35  ;;  %v637_v35 = vld [vmem:[%s1423_s8 + $0x18] sm:$0xff] }
  0x28   : > { %999 = vmatprep.subr.mxu0 %v431_v37  ;;  %v636_v37 = vld [vmem:[%s1423_s8 + $0x10] sm:$0xff] }
  0x29   : > { %1000 = vmatpush3.msra.mxu0 %v415_v39  ;;  %v635_v39 = vld [vmem:[%s1423_s8 + $0x8] sm:$0xff] }
  0x2a   : > { %1001 = vmatprep.subr.mxu0 %v430_v41  ;;  %v634_v41 = vld [vmem:[%s1423_s8] sm:$0xff] }
  0x2b   : > { %1002 = vmatpush3.msra.mxu0 %v414_v42 }
  0x2c   : > { %511 = vmatmul.mubr.f32.vlgmr.msra.gmra.mxu0 %v410_v43  ;;  %v391_v43 = vld [vmem:[%s375_s28 + $0x8] sm:$0xff] }
  0x2d   : > { %515 = vmatprep.mubr.f32.mxu0 %v413_v44  ;;  %v390_v44 = vld [vmem:[%s375_s28] sm:$0xff] }
  0x30   : > { %516 = vmatmul.mubr.f32.gmra.mxu0 %v412_v46 }
  0xec   : > { %v1003_v47 = vpop.f32.mrf.mxu0 }
  0xee   : > { %v1004_v48 = vpop.f32.mrf.mxu0 }
  0xef   : > { %v1005_v49 = vadd.f32 %v1004_v48, %v1003_v47 }
  0xf0   : > { %v1006_v50 = vpop.f32.mrf.mxu0 }
  0xf1   : > { %v522_v51 = vsel %vm521_vm0, %v1005_v49, -inf }
  0xf2   : > { %v1007_v52 = vpop.f32.mrf.mxu0  ;;  %523 = vmax.xlane.f32.xlu0 %v522_v51 }
  0xf3   : > { %v1008_v53 = vadd.f32 %v1007_v52, %v1006_v50  ;;  %v392_v50 = vld [vmem:[%s375_s28 + $0x10] sm:$0x1] }
  0xf5   : > { %v526_v54 = vsel %vm525_vm1, %v1008_v53, -inf }
  0xf6   : > { %527 = vmax.xlane.f32.xlu0 %v526_v54  ;;  %v748_v54 = vld [vmem:[%s1419_s4 + $0x18] sm:$0xff] }
  0xf7   : > { %1053 = vmatprep.subr.mxu0 %v748_v54 }
  0xf8   : > { %1054 = vmatpush3.msra.mxu0 %v748_v54 }
 0x17b   : > { %v524_v55 = vpop.xlane.xlu0 %523 }
 0x17c   : > { %v529_v56 = vsub.f32 %v1005_v49, %v524_v55  ;;  %v393_v49 = vld [vmem:[%s375_s28 + $0x18] sm:$0x1]  ;;  %v747_v55 = vld [vmem:[%s1419_s4 + $0x10] sm:$0xff] }
 0x17d   : > { %1055 = vmatprep.subr.mxu0 %v747_v55 }
 0x17e   : > { %v531_v57 = vmul.f32 1.442695, %v529_v56  ;;  %1056 = vmatpush3.msra.mxu0 %v747_v55  ;;  %v746_v56 = vld [vmem:[%s1419_s4 + $0x8] sm:$0xff] }
 0x17f   : > { %v528_v58 = vpop.xlane.xlu0 %527  ;;  %1057 = vmatprep.subr.mxu0 %v746_v56 }
 0x180   : > { %1073 = vpow2.f32 %v531_v57  ;;  %v530_v59 = vsub.f32 %v1008_v53, %v528_v58  ;;  %1058 = vmatpush3.msra.mxu0 %v746_v56  ;;  %v745_v57 = vld [vmem:[%s1419_s4] sm:$0xff] }
 0x181   : > { %1059 = vmatprep.subr.mxu0 %v745_v57 }
 0x182   : > { %v533_v60 = vmul.f32 1.442695, %v530_v59  ;;  %1060 = vmatpush3.msra.mxu0 %v745_v57 }
 0x184   : > { %1075 = vpow2.f32 %v533_v60  ;;  %v741_v60 = vld [vmem:[%s370_s21] sm:$0xff] }
 0x18d   : > { %v1074_v61 = vpop.eup %1073 }
 0x18e   : > { %v535_v62 = vsel %vm521_vm0, %v1074_v61, 0.0 }
 0x18f   : > { %536 = vadd.xlane.f32.xlu1 %v535_v62 }
 0x191   : > { %v1076_v63 = vpop.eup %1075 }
 0x192   : > { %v538_v0 = vsel %vm525_vm1, %v1076_v63, 0.0 }
 0x193   : > { %539 = vadd.xlane.f32.xlu1 %v538_v0 }
 0x218   : > { %v537_v5 = vpop.xlane.xlu1 %536 }
 0x219   : > { %1077 = vrcp.f32 %v537_v5 }
 0x21c   : > { %v540_v6 = vpop.xlane.xlu1 %539 }
 0x21d   : > { %1079 = vrcp.f32 %v540_v6 }
 0x226   : > { %v1078_v7 = vpop.eup %1077 }
 0x227   : > { %v543_v8 = vmul.f32 %v1078_v7, %v1074_v61 }
 0x229   : > { %958 = vmatmul.mubr.msk.f32.vlgmr.msra.gmra.mxu1 %vm521_vm0, %v543_v8 }
 0x22a   : > { %v1080_v12 = vpop.eup %1079  ;;  %623 = vmatprep.mubr.f32.mxu1 %v1097_v3  ;;  %1010 = vmatpush3.msra.mxu1 %v649_v9 }
 0x22b   : > { %v544_v14 = vmul.f32 %v1080_v12, %v1076_v63  ;;  %1011 = vmatprep.subr.mxu1 %v664_v10 }
 0x22c   : > { %1012 = vmatpush3.msra.mxu1 %v648_v11 }
 0x22d   : > { %959 = vmatmul.mubr.msk.f32.gmra.mxu1 %vm521_vm0, %v544_v14  ;;  %1013 = vmatprep.subr.mxu1 %v663_v13 }
 0x22e   : > { %1014 = vmatpush3.msra.mxu1 %v647_v15 }
 0x22f   : > { %1015 = vmatprep.subr.mxu1 %v662_v16 }
 0x230   : > { %1016 = vmatpush3.msra.mxu1 %v646_v17 }
 0x231   : > { %1017 = vmatprep.subr.mxu1 %v661_v18 }
 0x232   : > { %1018 = vmatpush3.msra.mxu1 %v645_v19 }
 0x233   : > { %1019 = vmatprep.subr.mxu1 %v660_v20 }
 0x234   : > { %1020 = vmatpush3.msra.mxu1 %v644_v21 }
 0x235   : > { %1021 = vmatprep.subr.mxu1 %v659_v22 }
 0x236   : > { %1022 = vmatpush3.msra.mxu1 %v643_v23 }
 0x237   : > { %1023 = vmatprep.subr.mxu1 %v658_v24 }
 0x238   : > { %1024 = vmatpush3.msra.mxu1 %v642_v25 }
 0x239   : > { %1025 = vmatprep.subr.mxu1 %v657_v26 }
 0x23a   : > { %1026 = vmatpush3.msra.mxu1 %v641_v27 }
 0x23b   : > { %1027 = vmatprep.subr.mxu1 %v656_v28 }
 0x23c   : > { %1028 = vmatpush3.msra.mxu1 %v640_v29 }
 0x23d   : > { %1029 = vmatprep.subr.mxu1 %v655_v30 }
 0x23e   : > { %1030 = vmatpush3.msra.mxu1 %v639_v31 }
 0x23f   : > { %1031 = vmatprep.subr.mxu1 %v654_v32 }
 0x240   : > { %1032 = vmatpush3.msra.mxu1 %v638_v33 }
 0x241   : > { %1033 = vmatprep.subr.mxu1 %v653_v34 }
 0x242   : > { %1034 = vmatpush3.msra.mxu1 %v637_v35 }
 0x243   : > { %1035 = vmatprep.subr.mxu1 %v652_v36 }
 0x244   : > { %1036 = vmatpush3.msra.mxu1 %v636_v37 }
 0x245   : > { %1037 = vmatprep.subr.mxu1 %v651_v38 }
 0x246   : > { %1038 = vmatpush3.msra.mxu1 %v635_v39 }
 0x247   : > { %1039 = vmatprep.subr.mxu1 %v650_v40 }
 0x248   : > { %1040 = vmatpush3.msra.mxu1 %v634_v41 }
 0x2e9   : > { %v619_v42 = vpop.f32.mrf.mxu1 }
 0x2ea   : > { %v630_v47 = vmul.f32 %v619_v42, %v390_v44 }
 0x2eb   : > { %v621_v45 = vpop.f32.mrf.mxu1 }
 0x2ec   : > { %v631_v46 = vmul.f32 %v621_v45, %v391_v43 }
 0x2ed   : > { %v625_v48 = vpop.f32.mrf.mxu1 }
 0x2ee   : > { %730 = vmatprep.mubr.f32.mxu1 %v631_v46  ;;  %v632_v53 = vmul.f32 %v625_v48, %v392_v50 }
 0x2ef   : > { %v627_v51 = vpop.f32.mrf.mxu1  ;;  %731 = vmatmul.mubr.f32.vlgmr.msra.gmra.mxu1 %v630_v47 }
 0x2f0   : > { %v633_v52 = vmul.f32 %v627_v51, %v393_v49 }
 0x2f2   : > { %735 = vmatprep.mubr.f32.mxu1 %v633_v52 }
 0x2f3   : > { %736 = vmatmul.mubr.f32.gmra.mxu1 %v632_v53 }
 0x3af   : > { %v1041_v58 = vpop.f32.mrf.mxu1 }
 0x3b1   : > { %v1042_v59 = vpop.f32.mrf.mxu1 }
 0x3b2   : > { %v1043_v61 = vadd.f32 %v1042_v59, %v1041_v58 }
 0x3b3   : > { %v1044_v62 = vpop.f32.mrf.mxu1 }
 0x3b4   : > { %v743_v63 = vadd.f32 %v1043_v61, %v741_v60 }
 0x3b5   : > { %v1045_v0 = vpop.f32.mrf.mxu1 }
 0x3b6   : > { %v1046_v2 = vadd.f32 %v1045_v0, %v1044_v62  ;;  %1061 = vmatprep.mubr.msk.f32.mxu0 %vm756_vm2, %v743_v63 }
 0x3b8   : > { %v744_v3 = vadd.f32 %v1046_v2, %v742_v1 }
 0x3ba   : > { %1062 = vmatmul.mubr.msk.f32.vlgmr.msra.gmra.mxu0 %vm756_vm2, %v744_v3 }
 0x47a   : > { %v1063_v5 = vpop.f32.mrf.mxu0 }
 0x47b   : > { %v835_v6 = vadd.f32 %v1063_v5, %v960_v4 }
 0x47c   : > { %v829_v7 = vpop.f32.mrf.mxu0 }
 0x47d   : > { %v964_v8 = vmul.f32 -1.442695, %v835_v6  ;;  %v830_v9 = vadd.f32 %v960_v4, %v829_v7 }
 0x47f   : > { %1081 = vpow2.f32 %v964_v8  ;;  %v963_v10 = vmul.f32 -1.442695, %v830_v9 }
 0x481   : > { %1083 = vpow2.f32 %v963_v10 }
 0x48c   : > { %v1082_v11 = vpop.eup %1081 }
 0x48d   : > { %v845_v12 = vadd.f32 1.0, %v1082_v11 }
 0x48e   : > { %v1084_v13 = vpop.eup %1083 }
 0x48f   : > { %1085 = vrcp.f32 %v845_v12  ;;  %v844_v14 = vadd.f32 1.0, %v1084_v13 }
 0x491   : > { %1087 = vrcp.f32 %v844_v14 }
 0x49c   : > { %v1086_v15 = vpop.eup %1085 }
 0x49d   : > { %852 = vst.msk [vmem:[%s389_s26 + $0x8] sm:$0x1] %vm851_vm3, %v1086_v15 }
 0x49e   : > { %v1088_v16 = vpop.eup %1087 }
 0x49f   : > { %850 = vst.msk [vmem:[%s389_s26] sm:$0xff] %vm756_vm2, %v1088_v16 }
 0x4a0 PF: > { %s19_s30 = sadd.s32 1, %s1095_s30  }
 0x4a1   : > { %p16_p4 = scmp.ge.s32.totalorder %s19_s30, 4  }
 0x4a3   :  { %18 = sbr.rel (!%p16_p4) target bundleno = 1 (0x1), region = 95 }

</bundles_post_ra>
